<compile_context>
chip_gen: v7x
topology: tpu7x:2x2x1
jax: 0.10.0
libtpu: 0.0.40
codegen_flags: <defaults>
</compile_context>

<pallas_src>
import jax
import jax.numpy as jnp
from jax.experimental import pallas as pl
from jax.experimental.pallas import tpu as pltpu

STATE_DIM = 3
ACTION_DIM = 1
H1 = 128                  # fc1 / fc2 output width
H3 = 128                  # fc3 output width
H12 = 2 * H1              # 256 (fc3 input width)
LANE = 128


def _round_up(x, m):
    return ((x + m - 1) // m) * m


def critic_kernel(st_ref, at_ref, w1t_ref, b1c_ref, w2c_ref, b2c_ref,
                  w3t_ref, b3c_ref, w4r_ref, b4_ref, out_ref):
    """All activations are (features, batch_tile): batch lives on the lane axis."""
    # fc1 + ReLU: (128, 3) @ (3, tb) on the MXU; bias is a lane-broadcast column.
    sT = jnp.dot(w1t_ref[...], st_ref[...], preferred_element_type=jnp.float32)
    sT = jnp.maximum(sT + b1c_ref[...], 0.0)                          # (128, tb)

    # fc2 + ReLU (action_dim == 1): rank-1 outer product, pure VPU.
    aT = jnp.maximum(w2c_ref[...] * at_ref[...] + b2c_ref[...], 0.0)  # (128, tb)

    # fc3 + ReLU: concat(s, a) @ W3 folded into two (128,128)@(128,tb) MXU passes.
    hT = (jnp.dot(w3t_ref[:, :H1], sT, preferred_element_type=jnp.float32)
          + jnp.dot(w3t_ref[:, H1:], aT, preferred_element_type=jnp.float32))
    hT = jnp.maximum(hT + b3c_ref[...], 0.0)                          # (128, tb)

    # fc4 head: (1, 128) @ (128, tb) -> lane-dense (1, tb) output row; b4 in SMEM.
    out_ref[...] = (jnp.dot(w4r_ref[...], hT, preferred_element_type=jnp.float32)
                    + b4_ref[0, 0])


def critic_forward(state, action, packed, *, tile_b=2048):
    """Run the critic on a batch of any size B (pad-and-slice on the lane axis)."""
    B = state.shape[0]
    st = state.astype(jnp.float32).T            # (3, B)  tiny transpose
    at = action.astype(jnp.float32).T           # (1, B)  free (dim-1 transpose)

    b_aligned = _round_up(B, LANE)
    tb = min(_round_up(tile_b, LANE), b_aligned)
    # If halving the tile still leaves >= 2 full lane tiles, do it so the
    # "parallel" batch axis has >= 2 steps (keeps v7x's 2nd TensorCore busy;
    # costs only one extra ~0.35us step on single-TC v5e/v6e).
    if b_aligned >= 2 * LANE and tb > b_aligned // 2:
        tb = _round_up(-(-b_aligned // 2), LANE)
    Bp = _round_up(b_aligned, tb)
    if Bp != B:
        st = jnp.pad(st, ((0, 0), (0, Bp - B)))
        at = jnp.pad(at, ((0, 0), (0, Bp - B)))
    grid = (Bp // tb,)

    flops = 2 * Bp * (STATE_DIM * H1 + ACTION_DIM * H1 + H12 * H3 + H3)
    bytes_accessed = 4 * (Bp * (STATE_DIM + ACTION_DIM + 1)
                          + H1 * (STATE_DIM + ACTION_DIM + 2)
                          + H12 * H3 + 2 * H3 + 1)

    out2d = pl.pallas_call(
        critic_kernel,
        out_shape=jax.ShapeDtypeStruct((1, Bp), jnp.float32),
        grid=grid,
        in_specs=[
            pl.BlockSpec((STATE_DIM, tb), lambda i: (0, i)),     # state^T tile
            pl.BlockSpec((ACTION_DIM, tb), lambda i: (0, i)),    # action^T tile
            pl.BlockSpec((H1, STATE_DIM), lambda i: (0, 0)),     # W1^T (resident)
            pl.BlockSpec((H1, 1), lambda i: (0, 0)),             # b1 column
            pl.BlockSpec((H1, ACTION_DIM), lambda i: (0, 0)),    # W2^T column
            pl.BlockSpec((H1, 1), lambda i: (0, 0)),             # b2 column
            pl.BlockSpec((H3, H12), lambda i: (0, 0)),           # W3^T (resident)
            pl.BlockSpec((H3, 1), lambda i: (0, 0)),             # b3 column
            pl.BlockSpec((1, H3), lambda i: (0, 0)),             # W4 row
            pl.BlockSpec((1, 1), lambda i: (0, 0),
                         memory_space=pltpu.MemorySpace.SMEM),   # b4 scalar
        ],
        out_specs=pl.BlockSpec((1, tb), lambda i: (0, i)),       # lane-dense row
        compiler_params=pltpu.CompilerParams(
            dimension_semantics=("parallel",)),
        cost_estimate=pl.CostEstimate(
            flops=flops, transcendentals=0, bytes_accessed=bytes_accessed),
    )(st, at, packed["w1t"], packed["b1c"], packed["w2c"], packed["b2c"],
      packed["w3t"], packed["b3c"], packed["w4r"], packed["b4"])

    # (1, Bp) -> (B, 1): slice the padded tail, free row-major reshape.
    return out2d[:, :B].reshape(B, 1)


def init_params(key):
    """Deterministic init mirroring the PyTorch module.

    xavier_normal_ for fc1/fc2/fc3 weights, uniform(-EPS, EPS) for fc4 weight,
    PyTorch-default uniform for biases. Weights stored as (in, out)."""
    EPS = 0.003
    ks = jax.random.split(key, 8)

    def xavier_normal(k, fan_in, fan_out):
        std = (2.0 / (fan_in + fan_out)) ** 0.5
        return std * jax.random.normal(k, (fan_in, fan_out), dtype=jnp.float32)

    def bias_uniform(k, fan_in, fan_out):
        bound = 1.0 / (fan_in ** 0.5)
        return jax.random.uniform(k, (1, fan_out), dtype=jnp.float32,
                                  minval=-bound, maxval=bound)

    return {
        "w1": xavier_normal(ks[0], STATE_DIM, H1),
        "b1": bias_uniform(ks[1], STATE_DIM, H1),
        "w2": xavier_normal(ks[2], ACTION_DIM, H1),
        "b2": bias_uniform(ks[3], ACTION_DIM, H1),
        "w3": xavier_normal(ks[4], H12, H3),
        "b3": bias_uniform(ks[5], H12, H3),
        "w4": jax.random.uniform(ks[6], (H3, 1), dtype=jnp.float32,
                                 minval=-EPS, maxval=EPS),
        "b4": bias_uniform(ks[7], H3, 1),
    }


def pack_params(params):
    """Pre-transpose params into the batch-on-lanes layout the kernel expects."""
    return {
        "w1t": params["w1"].T,      # (128, 3)
        "b1c": params["b1"].T,      # (128, 1)
        "w2c": params["w2"].T,      # (128, 1)
        "b2c": params["b2"].T,      # (128, 1)
        "w3t": params["w3"].T,      # (128, 256)  [:, :128] s-half, [:, 128:] a-half
        "b3c": params["b3"].T,      # (128, 1)
        "w4r": params["w4"].T,      # (1, 128)
        "b4": params["b4"],         # (1, 1)
    }


def critic_ref(state, action, params):
    """Pure-JAX reference (mirrors the PyTorch forward exactly)."""
    s = jax.nn.relu(state @ params["w1"] + params["b1"])
    a = jax.nn.relu(action @ params["w2"] + params["b2"])
    sa = jnp.concatenate([s, a], axis=-1)
    h = jax.nn.relu(sa @ params["w3"] + params["b3"])
    return h @ params["w4"] + params["b4"]


if __name__ == "__main__":
    key = jax.random.PRNGKey(0)
    k_param, k_state, k_action = jax.random.split(key, 3)

    params = init_params(k_param)
    packed = pack_params(params)

    # Small demo batch (single grid step; lane tile fully padded).
    B = 8
    state = jax.random.normal(k_state, (B, STATE_DIM), dtype=jnp.float32)
    action = jax.random.normal(k_action, (B, ACTION_DIM), dtype=jnp.float32)
    out = jax.block_until_ready(critic_forward(state, action, packed))
    expected = critic_ref(state, action, params)
    assert out.shape == (B, 1)
    assert jnp.allclose(out, expected, atol=5e-4, rtol=1e-4), "mismatch (B=8)"

    # Exercise the multi-step parallel grid + ragged-tail (pad-and-slice) path.
    B2 = 300
    state2 = jax.random.normal(k_state, (B2, STATE_DIM), dtype=jnp.float32)
    action2 = jax.random.normal(k_action, (B2, ACTION_DIM), dtype=jnp.float32)
    out2 = jax.block_until_ready(
        critic_forward(state2, action2, packed, tile_b=128))
    expected2 = critic_ref(state2, action2, params)
    assert out2.shape == (B2, 1)
    assert jnp.allclose(out2, expected2, atol=5e-4, rtol=1e-4), "mismatch (B=300)"

    print("KERNEL_OK")
</pallas_src>

<mosaic_0001>
module attributes {stable_mosaic.version = 11 : i64} {
  func.func @critic_kernel(%arg0: i32, %arg1: memref<3x128xf32, #tpu.memory_space<vmem>>, %arg2: memref<1x128xf32, #tpu.memory_space<vmem>>, %arg3: memref<128x3xf32, #tpu.memory_space<vmem>>, %arg4: memref<128x1xf32, #tpu.memory_space<vmem>>, %arg5: memref<128x1xf32, #tpu.memory_space<vmem>>, %arg6: memref<128x1xf32, #tpu.memory_space<vmem>>, %arg7: memref<128x256xf32, #tpu.memory_space<vmem>>, %arg8: memref<128x1xf32, #tpu.memory_space<vmem>>, %arg9: memref<1x128xf32, #tpu.memory_space<vmem>>, %arg10: memref<1x1xf32, #tpu.memory_space<smem>>, %arg11: memref<1x128xf32, #tpu.memory_space<vmem>>) attributes {dimension_semantics = [#tpu.dimension_semantics<parallel>], iteration_bounds = array<i64: 1>, scalar_prefetch = 0 : i64, scratch_operands = 0 : i64, tpu.core_type = #tpu.core_type<tc>, window_params = [{transform_indices = @transform_0, window_bounds = array<i64: 3, 128>}, {transform_indices = @transform_1, window_bounds = array<i64: 1, 128>}, {pipeline_mode = #tpu.pipeline_mode<synchronous>, transform_indices = @transform_2, window_bounds = array<i64: 128, 3>}, {pipeline_mode = #tpu.pipeline_mode<synchronous>, transform_indices = @transform_3, window_bounds = array<i64: 128, 1>}, {pipeline_mode = #tpu.pipeline_mode<synchronous>, transform_indices = @transform_4, window_bounds = array<i64: 128, 1>}, {pipeline_mode = #tpu.pipeline_mode<synchronous>, transform_indices = @transform_5, window_bounds = array<i64: 128, 1>}, {pipeline_mode = #tpu.pipeline_mode<synchronous>, transform_indices = @transform_6, window_bounds = array<i64: 128, 256>}, {pipeline_mode = #tpu.pipeline_mode<synchronous>, transform_indices = @transform_7, window_bounds = array<i64: 128, 1>}, {pipeline_mode = #tpu.pipeline_mode<synchronous>, transform_indices = @transform_8, window_bounds = array<i64: 1, 128>}, {transform_indices = @transform_9, window_bounds = array<i64: 1, 1>}, {transform_indices = @transform_10, window_bounds = array<i64: 1, 128>}]} {
    %c0 = arith.constant 0 : index
    %c0_0 = arith.constant 0 : index
    %0 = vector.load %arg3[%c0, %c0_0] : memref<128x3xf32, #tpu.memory_space<vmem>>, vector<128x3xf32>
    %c0_1 = arith.constant 0 : index
    %c0_2 = arith.constant 0 : index
    %1 = vector.load %arg1[%c0_1, %c0_2] : memref<3x128xf32, #tpu.memory_space<vmem>>, vector<3x128xf32>
    %cst = arith.constant dense<0.000000e+00> : vector<128x128xf32>
    %2 = tpu.matmul %0, %1, %cst {dimension_numbers = #tpu.dot_dimension_numbers<[1], [0], [0], [1], [0, 0, 1, 1], [], []>} : vector<128x3xf32>, vector<3x128xf32>, vector<128x128xf32> -> vector<128x128xf32>
    %c0_3 = arith.constant 0 : index
    %c0_4 = arith.constant 0 : index
    %3 = vector.load %arg4[%c0_3, %c0_4] : memref<128x1xf32, #tpu.memory_space<vmem>>, vector<128x1xf32>
    %4 = vector.broadcast %3 : vector<128x1xf32> to vector<128x128xf32>
    %5 = arith.addf %2, %4 : vector<128x128xf32>
    %cst_5 = arith.constant 0.000000e+00 : f32
    %6 = vector.broadcast %cst_5 : f32 to vector<128x128xf32>
    %7 = arith.maximumf %5, %6 : vector<128x128xf32>
    %c0_6 = arith.constant 0 : index
    %c0_7 = arith.constant 0 : index
    %8 = vector.load %arg5[%c0_6, %c0_7] : memref<128x1xf32, #tpu.memory_space<vmem>>, vector<128x1xf32>
    %c0_8 = arith.constant 0 : index
    %c0_9 = arith.constant 0 : index
    %9 = vector.load %arg2[%c0_8, %c0_9] : memref<1x128xf32, #tpu.memory_space<vmem>>, vector<1x128xf32>
    %10 = vector.broadcast %8 : vector<128x1xf32> to vector<128x128xf32>
    %11 = vector.broadcast %9 : vector<1x128xf32> to vector<128x128xf32>
    %12 = arith.mulf %10, %11 : vector<128x128xf32>
    %c0_10 = arith.constant 0 : index
    %c0_11 = arith.constant 0 : index
    %13 = vector.load %arg6[%c0_10, %c0_11] : memref<128x1xf32, #tpu.memory_space<vmem>>, vector<128x1xf32>
    %14 = vector.broadcast %13 : vector<128x1xf32> to vector<128x128xf32>
    %15 = arith.addf %12, %14 : vector<128x128xf32>
    %cst_12 = arith.constant 0.000000e+00 : f32
    %16 = vector.broadcast %cst_12 : f32 to vector<128x128xf32>
    %17 = arith.maximumf %15, %16 : vector<128x128xf32>
    %c0_13 = arith.constant 0 : index
    %c0_14 = arith.constant 0 : index
    %18 = vector.load %arg7[%c0_13, %c0_14] : memref<128x256xf32, #tpu.memory_space<vmem>>, vector<128x128xf32>
    %cst_15 = arith.constant dense<0.000000e+00> : vector<128x128xf32>
    %19 = tpu.matmul %18, %7, %cst_15 {dimension_numbers = #tpu.dot_dimension_numbers<[1], [0], [0], [1], [0, 0, 1, 1], [], []>} : vector<128x128xf32>, vector<128x128xf32>, vector<128x128xf32> -> vector<128x128xf32>
    %c0_16 = arith.constant 0 : index
    %c128 = arith.constant 128 : index
    %20 = vector.load %arg7[%c0_16, %c128] : memref<128x256xf32, #tpu.memory_space<vmem>>, vector<128x128xf32>
    %cst_17 = arith.constant dense<0.000000e+00> : vector<128x128xf32>
    %21 = tpu.matmul %20, %17, %cst_17 {dimension_numbers = #tpu.dot_dimension_numbers<[1], [0], [0], [1], [0, 0, 1, 1], [], []>} : vector<128x128xf32>, vector<128x128xf32>, vector<128x128xf32> -> vector<128x128xf32>
    %22 = arith.addf %19, %21 : vector<128x128xf32>
    %c0_18 = arith.constant 0 : index
    %c0_19 = arith.constant 0 : index
    %23 = vector.load %arg8[%c0_18, %c0_19] : memref<128x1xf32, #tpu.memory_space<vmem>>, vector<128x1xf32>
    %24 = vector.broadcast %23 : vector<128x1xf32> to vector<128x128xf32>
    %25 = arith.addf %22, %24 : vector<128x128xf32>
    %cst_20 = arith.constant 0.000000e+00 : f32
    %26 = vector.broadcast %cst_20 : f32 to vector<128x128xf32>
    %27 = arith.maximumf %25, %26 : vector<128x128xf32>
    %c0_21 = arith.constant 0 : index
    %c0_22 = arith.constant 0 : index
    %28 = vector.load %arg9[%c0_21, %c0_22] : memref<1x128xf32, #tpu.memory_space<vmem>>, vector<1x128xf32>
    %cst_23 = arith.constant dense<0.000000e+00> : vector<1x128xf32>
    %29 = tpu.matmul %28, %27, %cst_23 {dimension_numbers = #tpu.dot_dimension_numbers<[1], [0], [0], [1], [0, 0, 1, 1], [], []>} : vector<1x128xf32>, vector<128x128xf32>, vector<1x128xf32> -> vector<1x128xf32>
    %c0_24 = arith.constant 0 : index
    %c0_25 = arith.constant 0 : index
    %30 = memref.load %arg10[%c0_24, %c0_25] : memref<1x1xf32, #tpu.memory_space<smem>>
    %31 = vector.broadcast %30 : f32 to vector<1x128xf32>
    %32 = arith.addf %29, %31 : vector<1x128xf32>
    %c0_26 = arith.constant 0 : index
    %c0_27 = arith.constant 0 : index
    %33 = vector.load %arg11[%c0_26, %c0_27] : memref<1x128xf32, #tpu.memory_space<vmem>>, vector<1x128xf32>
    tpu.vector_store %arg11[%c0_26, %c0_27], %32 {strides = array<i32>} : memref<1x128xf32, #tpu.memory_space<vmem>>, vector<1x128xf32>,
    return
  }
  func.func @transform_0(%arg0: i32) -> (i32, i32) {
    %c0_i32 = arith.constant 0 : i32
    %c0_i32_0 = arith.constant 0 : i32
    return %c0_i32, %arg0 : i32, i32
  }
  func.func @transform_1(%arg0: i32) -> (i32, i32) {
    %c0_i32 = arith.constant 0 : i32
    %c0_i32_0 = arith.constant 0 : i32
    return %c0_i32, %arg0 : i32, i32
  }
  func.func @transform_2(%arg0: i32) -> (i32, i32) {
    %c0_i32 = arith.constant 0 : i32
    %c0_i32_0 = arith.constant 0 : i32
    %c0_i32_1 = arith.constant 0 : i32
    return %c0_i32, %c0_i32_0 : i32, i32
  }
  func.func @transform_3(%arg0: i32) -> (i32, i32) {
    %c0_i32 = arith.constant 0 : i32
    %c0_i32_0 = arith.constant 0 : i32
    %c0_i32_1 = arith.constant 0 : i32
    return %c0_i32, %c0_i32_0 : i32, i32
  }
  func.func @transform_4(%arg0: i32) -> (i32, i32) {
    %c0_i32 = arith.constant 0 : i32
    %c0_i32_0 = arith.constant 0 : i32
    %c0_i32_1 = arith.constant 0 : i32
    return %c0_i32, %c0_i32_0 : i32, i32
  }
  func.func @transform_5(%arg0: i32) -> (i32, i32) {
    %c0_i32 = arith.constant 0 : i32
    %c0_i32_0 = arith.constant 0 : i32
    %c0_i32_1 = arith.constant 0 : i32
    return %c0_i32, %c0_i32_0 : i32, i32
  }
  func.func @transform_6(%arg0: i32) -> (i32, i32) {
    %c0_i32 = arith.constant 0 : i32
    %c0_i32_0 = arith.constant 0 : i32
    %c0_i32_1 = arith.constant 0 : i32
    return %c0_i32, %c0_i32_0 : i32, i32
  }
  func.func @transform_7(%arg0: i32) -> (i32, i32) {
    %c0_i32 = arith.constant 0 : i32
    %c0_i32_0 = arith.constant 0 : i32
    %c0_i32_1 = arith.constant 0 : i32
    return %c0_i32, %c0_i32_0 : i32, i32
  }
  func.func @transform_8(%arg0: i32) -> (i32, i32) {
    %c0_i32 = arith.constant 0 : i32
    %c0_i32_0 = arith.constant 0 : i32
    %c0_i32_1 = arith.constant 0 : i32
    return %c0_i32, %c0_i32_0 : i32, i32
  }
  func.func @transform_9(%arg0: i32) -> (i32, i32) {
    %c0_i32 = arith.constant 0 : i32
    %c0_i32_0 = arith.constant 0 : i32
    %c0_i32_1 = arith.constant 0 : i32
    return %c0_i32, %c0_i32_0 : i32, i32
  }
  func.func @transform_10(%arg0: i32) -> (i32, i32) {
    %c0_i32 = arith.constant 0 : i32
    %c0_i32_0 = arith.constant 0 : i32
    return %c0_i32, %arg0 : i32, i32
  }
}

</mosaic_0001>

<bundles_post_ra>
// kernel: tpu_custom_call.1
= control target key start
LH: loop header
LB: loop body
LE: loop exit
PB: predicated region body
PF: predicated region fallthrough
CT: control target
= control target key end

     0   :  { %vm199_vm0 = vcmask 1042432   ;;  %v1573_v3 = vmov 0   ;;  %vm150_vm1 = vcmask 23552   ;;  %s2101_s0 = inlined_call_operand.vmem [shape: f32[3,128], index: 0, kind: input, shape index: {}]   ;;  %s2102_s1 = inlined_call_operand.vmem [shape: f32[1,128], index: 1, kind: input, shape index: {}]   ;;  %s2103_s2 = inlined_call_operand.vmem [shape: f32[128,3], index: 2, kind: input, shape index: {}]   ;;  %s2104_s3 = inlined_call_operand.vmem [shape: f32[128,1], index: 3, kind: input, shape index: {}]   ;;  %s2105_s4 = inlined_call_operand.vmem [shape: f32[128,1], index: 4, kind: input, shape index: {}]   ;;  %s2106_s5 = inlined_call_operand.vmem [shape: f32[128,1], index: 5, kind: input, shape index: {}]   ;;  %s2107_s6 = inlined_call_operand.vmem [shape: f32[128,256], index: 6, kind: input, shape index: {}]   ;;  %s2108_s7 = inlined_call_operand.vmem [shape: f32[128,1], index: 7, kind: input, shape index: {}]   ;;  %s2109_s8 = inlined_call_operand.vmem [shape: f32[1,128], index: 8, kind: input, shape index: {}]   ;;  %s2110_s9 = inlined_call_operand.<no memory space> [shape: f32[1,1], index: 9, kind: input, shape index: {}]   ;;  %s2111_s10 = inlined_call_operand.hbm [shape: f32[1,128], index: 10, kind: output, shape index: {}]  }
   0x1   :  { %v53_v0 = vld [vmem:[%s2101_s0] sm:$0x7]  ;;  %1548 = vset.pattern.permute.xlu1 %v1573_v3  ;;  %1547 = vset.pattern.permute.xlu0 %v1573_v3  ;;  %v38_v5 = vld [vmem:[%s2103_s2 + $0x8] sm:$0xff]  ;;  %v39_v7 = vld [vmem:[%s2103_s2 + $0x10] sm:$0xff] }
   0x2   :  { %v364_v1 = vld [vmem:[%s2105_s4] sm:$0xff]  ;;  %1265 = vmatprep.subr.msk.mxu1 %vm199_vm0, %v53_v0  ;;  %v365_v6 = vld [vmem:[%s2105_s4 + $0x8] sm:$0xff]  ;;  %v40_v9 = vld [vmem:[%s2103_s2 + $0x18] sm:$0xff] }
   0x3   :  { %v54_v2 = vld [vmem:[%s2104_s3] sm:$0xff]  ;;  %383 = vperm.xlu0 %1547, %v364_v1   ;;  %1266 = vmatpush3.msk.msra.mxu1 %vm199_vm0, %v53_v0  ;;  %v55_v8 = vld [vmem:[%s2104_s3 + $0x8] sm:$0xff]  ;;  %v366_v14 = vld [vmem:[%s2105_s4 + $0x10] sm:$0xff] }
   0x4   :  { %v37_v4 = vld [vmem:[%s2103_s2] sm:$0xff]  ;;  %72 = vperm.xlu1 %1548, %v54_v2   ;;  %v484_v12 = vld [vmem:[%s2106_s5 + $0x8] sm:$0xff]  ;;  %v43_v15 = vld [vmem:[%s2103_s2 + $0x30] sm:$0xff] }
   0x5   :  { %1267 = vmatprep.mubr.msk.f32.mxu1 %vm150_vm1, %v37_v4  ;;  %v483_v10 = vld [vmem:[%s2106_s5] sm:$0xff]  ;;  %v42_v13 = vld [vmem:[%s2103_s2 + $0x28] sm:$0xff]  ;;  %v367_v16 = vld [vmem:[%s2105_s4 + $0x18] sm:$0xff] }
   0x6   :  { %1268 = vmatmul.mubr.msk.f32.vlgmr.msra.gmra.mrb[0].mxu1 %vm150_vm1, %v38_v5  ;;  %v41_v11 = vld [vmem:[%s2103_s2 + $0x20] sm:$0xff]  ;;  %v44_v17 = vld [vmem:[%s2103_s2 + $0x38] sm:$0xff]  ;;  %v56_v18 = vld [vmem:[%s2104_s3 + $0x10] sm:$0xff] }
   0x7   :  { %388 = vperm.xlu0 %1547, %v365_v6   ;;  %1270 = vmatprep.mubr.msk.f32.mxu1 %vm150_vm1, %v39_v7  ;;  %v45_v19 = vld [vmem:[%s2103_s2 + $0x40] sm:$0xff]  ;;  %v57_v20 = vld [vmem:[%s2104_s3 + $0x18] sm:$0xff]  ;;  %v46_v21 = vld [vmem:[%s2103_s2 + $0x48] sm:$0xff] }
   0x8   :  { %77 = vperm.xlu1 %1548, %v55_v8   ;;  %v485_v22 = vld [vmem:[%s2106_s5 + $0x10] sm:$0xff]  ;;  %v486_v24 = vld [vmem:[%s2106_s5 + $0x18] sm:$0xff]  ;;  %v368_v26 = vld [vmem:[%s2105_s4 + $0x20] sm:$0xff] }
   0x9   :  { %v47_v23 = vld [vmem:[%s2103_s2 + $0x50] sm:$0xff]  ;;  %v48_v25 = vld [vmem:[%s2103_s2 + $0x58] sm:$0xff]  ;;  %v49_v27 = vld [vmem:[%s2103_s2 + $0x60] sm:$0xff] }
   0xa   :  { %1271 = vmatmul.mubr.msk.f32.gmra.mrb[2].mxu1 %vm150_vm1, %v40_v9  ;;  %v369_v28 = vld [vmem:[%s2105_s4 + $0x28] sm:$0xff]  ;;  %v58_v30 = vld [vmem:[%s2104_s3 + $0x20] sm:$0xff]  ;;  %v51_v31 = vld [vmem:[%s2103_s2 + $0x70] sm:$0xff] }
   0xb   :  { %501 = vperm.xlu0 %1547, %v483_v10   ;;  %1273 = vmatprep.mubr.msk.f32.mxu1 %vm150_vm1, %v41_v11  ;;  %v50_v29 = vld [vmem:[%s2103_s2 + $0x68] sm:$0xff] }
   0xc   :  { %506 = vperm.xlu1 %1548, %v484_v12  }
   0xe   :  { %1274 = vmatmul.mubr.msk.f32.gmra.mrb[4].mxu1 %vm150_vm1, %v42_v13 }
   0xf   :  { %393 = vperm.xlu0 %1547, %v366_v14   ;;  %1276 = vmatprep.mubr.msk.f32.mxu1 %vm150_vm1, %v43_v15 }
  0x10   :  { %398 = vperm.xlu1 %1548, %v367_v16  }
  0x12   :  { %1277 = vmatmul.mubr.msk.f32.gmra.mrb[6].mxu1 %vm150_vm1, %v44_v17 }
  0x13   :  { %82 = vperm.xlu0 %1547, %v56_v18   ;;  %1279 = vmatprep.mubr.msk.f32.mxu1 %vm150_vm1, %v45_v19 }
  0x14   :  { %87 = vperm.xlu1 %1548, %v57_v20  }
  0x16   :  { %1280 = vmatmul.mubr.msk.f32.gmra.mrb[8].mxu1 %vm150_vm1, %v46_v21 }
  0x17   :  { %511 = vperm.xlu0 %1547, %v485_v22   ;;  %1282 = vmatprep.mubr.msk.f32.mxu1 %vm150_vm1, %v47_v23 }
  0x18   :  { %516 = vperm.xlu1 %1548, %v486_v24  }
  0x1a   :  { %1283 = vmatmul.mubr.msk.f32.gmra.mrb[10].mxu1 %vm150_vm1, %v48_v25 }
  0x1b   :  { %403 = vperm.xlu0 %1547, %v368_v26   ;;  %1285 = vmatprep.mubr.msk.f32.mxu1 %vm150_vm1, %v49_v27 }
  0x1c   :  { %408 = vperm.xlu1 %1548, %v369_v28  }
  0x1d   :  { %16 = vsyncpa [#allocation4], 0  ;;  %v59_v32 = vld [vmem:[%s2104_s3 + $0x28] sm:$0xff]  ;;  %v52_v33 = vld [vmem:[%s2103_s2 + $0x78] sm:$0xff]  ;;  %vm1575_vm2 = vmmov 0   ;;  %s1577_s29 = smov [#allocation3]  }
  0x1e   :  { %1286 = vmatmul.mubr.msk.f32.gmra.mrb[12].mxu1 %vm150_vm1, %v50_v29  ;;  %v487_v34 = vld [vmem:[%s2106_s5 + $0x20] sm:$0xff]  ;;  %v488_v35 = vld [vmem:[%s2106_s5 + $0x28] sm:$0xff]  ;;  %v370_v36 = vld [vmem:[%s2105_s4 + $0x30] sm:$0xff]  ;;  %s1141_s30 = sshll.u32 %s1577_s29, 4  ;;  %s1142_s30 = int_to_ptr.vmem [resolvable:$true] %s1141_s30 }
  0x1f   :  { %92 = vperm.xlu0 %1547, %v58_v30   ;;  %1288 = vmatprep.mubr.msk.f32.mxu1 %vm150_vm1, %v51_v31  ;;  %v371_v37 = vld [vmem:[%s2105_s4 + $0x38] sm:$0xff]  ;;  %v60_v38 = vld [vmem:[%s2104_s3 + $0x30] sm:$0xff]  ;;  %v372_v42 = vld [vmem:[%s2105_s4 + $0x40] sm:$0xff]  ;;  %s1549_s11 = scalar_lea.vmem %s1142_s30, 16  ;;  %s1553_s12 = scalar_lea.vmem %s1142_s30, 32 }
  0x20   :  { %97 = vperm.xlu1 %1548, %v59_v32   ;;  %v61_v39 = vld [vmem:[%s2104_s3 + $0x38] sm:$0xff]  ;;  %v489_v40 = vld [vmem:[%s2106_s5 + $0x30] sm:$0xff]  ;;  %v373_v43 = vld [vmem:[%s2105_s4 + $0x48] sm:$0xff]  ;;  %p1550_p0 = scmp.ne.s32.totalorder %s1142_s30, %s1549_s11  ;;  %p1554_p1 = scmp.lt.s32.totalorder %s1142_s30, %s1142_s30 }
  0x21   :  { %v490_v41 = vld [vmem:[%s2106_s5 + $0x38] sm:$0xff]  ;;  %v62_v44 = vld [vmem:[%s2104_s3 + $0x40] sm:$0xff]  ;;  %v63_v45 = vld [vmem:[%s2104_s3 + $0x48] sm:$0xff]  ;;  %p1555_p2 = scmp.lt.s32.totalorder %s1553_s12, %s1549_s11 }
  0x22   :  { %1289 = vmatmul.mubr.msk.f32.gmra.mrb[14].mxu1 %vm150_vm1, %v52_v33  ;;  %v491_v46 = vld [vmem:[%s2106_s5 + $0x40] sm:$0xff]  ;;  %v492_v47 = vld [vmem:[%s2106_s5 + $0x48] sm:$0xff]  ;;  %v374_v48 = vld [vmem:[%s2105_s4 + $0x50] sm:$0xff] }
  0x23   :  { %521 = vperm.xlu0 %1547, %v487_v34   ;;  %v375_v49 = vld [vmem:[%s2105_s4 + $0x58] sm:$0xff]  ;;  %v64_v50 = vld [vmem:[%s2104_s3 + $0x50] sm:$0xff]  ;;  %v376_v54 = vld [vmem:[%s2105_s4 + $0x60] sm:$0xff]  ;;  %p1556_p3 = por %p1555_p2, %p1554_p1 }
  0x24   :  { %526 = vperm.xlu1 %1548, %v488_v35   ;;  %v65_v51 = vld [vmem:[%s2104_s3 + $0x58] sm:$0xff]  ;;  %v493_v52 = vld [vmem:[%s2106_s5 + $0x50] sm:$0xff]  ;;  %v377_v55 = vld [vmem:[%s2105_s4 + $0x68] sm:$0xff] }
  0x25   :  { %v494_v53 = vld [vmem:[%s2106_s5 + $0x58] sm:$0xff]  ;;  %v66_v56 = vld [vmem:[%s2104_s3 + $0x60] sm:$0xff]  ;;  %v67_v57 = vld [vmem:[%s2104_s3 + $0x68] sm:$0xff]  ;;  %p1557_p4 = pnand %p1556_p3, %p1550_p0 }
  0x26   :  { %v495_v58 = vld [vmem:[%s2106_s5 + $0x60] sm:$0xff]  ;;  %v496_v59 = vld [vmem:[%s2106_s5 + $0x68] sm:$0xff]  ;;  %v378_v60 = vld [vmem:[%s2105_s4 + $0x70] sm:$0xff] }
  0x27   :  { %413 = vperm.xlu0 %1547, %v370_v36   ;;  %v379_v61 = vld [vmem:[%s2105_s4 + $0x78] sm:$0xff]  ;;  %v68_v62 = vld [vmem:[%s2104_s3 + $0x70] sm:$0xff]  ;;  %v933_v2 = vld [vmem:[%s2108_s7] sm:$0xff] }
  0x28   :  { %418 = vperm.xlu1 %1548, %v371_v37   ;;  %v69_v63 = vld [vmem:[%s2104_s3 + $0x78] sm:$0xff]  ;;  %v497_v0 = vld [vmem:[%s2106_s5 + $0x70] sm:$0xff]  ;;  %v934_v3 = vld [vmem:[%s2108_s7 + $0x8] sm:$0xff] }
  0x29   :  { %v498_v1 = vld [vmem:[%s2106_s5 + $0x78] sm:$0xff]  ;;  %v935_v4 = vld [vmem:[%s2108_s7 + $0x10] sm:$0xff]  ;;  %v937_v6 = vld [vmem:[%s2108_s7 + $0x20] sm:$0xff] }
  0x2a   :  { %v936_v5 = vld [vmem:[%s2108_s7 + $0x18] sm:$0xff]  ;;  %v938_v7 = vld [vmem:[%s2108_s7 + $0x28] sm:$0xff]  ;;  %v939_v8 = vld [vmem:[%s2108_s7 + $0x30] sm:$0xff] }
  0x2b   :  { %102 = vperm.xlu0 %1547, %v60_v38   ;;  %v940_v9 = vld [vmem:[%s2108_s7 + $0x38] sm:$0xff]  ;;  %v941_v10 = vld [vmem:[%s2108_s7 + $0x40] sm:$0xff]  ;;  %v942_v11 = vld [vmem:[%s2108_s7 + $0x48] sm:$0xff] }
  0x2c   :  { %107 = vperm.xlu1 %1548, %v61_v39   ;;  %v943_v12 = vld [vmem:[%s2108_s7 + $0x50] sm:$0xff]  ;;  %v944_v13 = vld [vmem:[%s2108_s7 + $0x58] sm:$0xff]  ;;  %v945_v14 = vld [vmem:[%s2108_s7 + $0x60] sm:$0xff] }
  0x2d   :  { %v946_v15 = vld [vmem:[%s2108_s7 + $0x68] sm:$0xff]  ;;  %v947_v16 = vld [vmem:[%s2108_s7 + $0x70] sm:$0xff]  ;;  %v948_v17 = vld [vmem:[%s2108_s7 + $0x78] sm:$0xff] }
  0x2e   :  { %v627_v18 = vld [vmem:[%s2107_s6 + $0x8] sm:$0xff]  ;;  %v611_v19 = vld [vmem:[%s2107_s6] sm:$0xff] }
  0x2f   :  { %531 = vperm.xlu0 %1547, %v489_v40   ;;  %1323 = vmatprep.mubr.f32.mxu0 %v627_v18  ;;  %v1903_v22 = vld [vmem:[%s2102_s1] ss:$0 sm:$0xff] }
  0x30   :  { %536 = vperm.xlu1 %1548, %v490_v41   ;;  %1379 = vmatprep.mubr.f32.mxu1 %v611_v19 }
  0x33   :  { %423 = vperm.xlu0 %1547, %v372_v42  }
  0x34   :  { %428 = vperm.xlu1 %1548, %v373_v43  }
  0x37   :  { %112 = vperm.xlu0 %1547, %v62_v44  }
  0x38   :  { %117 = vperm.xlu1 %1548, %v63_v45  }
  0x3b   :  { %541 = vperm.xlu0 %1547, %v491_v46  }
  0x3c   :  { %546 = vperm.xlu1 %1548, %v492_v47  }
  0x3f   :  { %433 = vperm.xlu0 %1547, %v374_v48  }
  0x40   :  { %438 = vperm.xlu1 %1548, %v375_v49  }
  0x43   :  { %122 = vperm.xlu0 %1547, %v64_v50  }
  0x44   :  { %127 = vperm.xlu1 %1548, %v65_v51  }
  0x47   :  { %551 = vperm.xlu0 %1547, %v493_v52  }
  0x48   :  { %556 = vperm.xlu1 %1548, %v494_v53  }
  0x4b   :  { %443 = vperm.xlu0 %1547, %v376_v54  }
  0x4c   :  { %448 = vperm.xlu1 %1548, %v377_v55  }
  0x4f   :  { %132 = vperm.xlu0 %1547, %v66_v56  }
  0x50   :  { %137 = vperm.xlu1 %1548, %v67_v57  }
  0x53   :  { %561 = vperm.xlu0 %1547, %v495_v58  }
  0x54   :  { %566 = vperm.xlu1 %1548, %v496_v59  }
  0x57   :  { %453 = vperm.xlu0 %1547, %v378_v60  }
  0x58   :  { %458 = vperm.xlu1 %1548, %v379_v61  }
  0x5b   :  { %142 = vperm.xlu0 %1547, %v68_v62  }
  0x5c   :  { %147 = vperm.xlu1 %1548, %v69_v63  }
  0x5f   :  { %571 = vperm.xlu0 %1547, %v497_v0  }
  0x60   :  { %576 = vperm.xlu1 %1548, %v498_v1  }
  0x63   :  { %951 = vperm.xlu0 %1547, %v933_v2  }
  0x64   :  { %956 = vperm.xlu1 %1548, %v934_v3  }
  0x67   :  { %961 = vperm.xlu0 %1547, %v935_v4  }
  0x68   :  { %966 = vperm.xlu1 %1548, %v936_v5  }
  0x6b   :  { %971 = vperm.xlu0 %1547, %v937_v6  }
  0x6c   :  { %976 = vperm.xlu1 %1548, %v938_v7  }
  0x6f   :  { %981 = vperm.xlu0 %1547, %v939_v8  }
  0x70   :  { %986 = vperm.xlu1 %1548, %v940_v9  }
  0x73   :  { %991 = vperm.xlu0 %1547, %v941_v10  }
  0x74   :  { %996 = vperm.xlu1 %1548, %v942_v11  }
  0x77   :  { %1001 = vperm.xlu0 %1547, %v943_v12  }
  0x78   :  { %1006 = vperm.xlu1 %1548, %v944_v13  }
  0x7b   :  { %1011 = vperm.xlu0 %1547, %v945_v14  }
  0x7c   :  { %1016 = vperm.xlu1 %1548, %v946_v15  }
  0x7f   :  { %1021 = vperm.xlu0 %1547, %v947_v16  }
  0x80   :  { %1026 = vperm.xlu1 %1548, %v948_v17  }
  0x82   :  { %v384_v20 = vpop.permute.xlu0 %383 }
  0x83   :  { %v1898_v21 = vpop.permute.xlu1 %72  ;;  %v467_v24 = vmul.f32 %v1903_v22, %v384_v20 }
  0x86   :  { %v389_v23 = vpop.permute.xlu0 %388 }
  0x87   :  { %v1906_v25 = vpop.permute.xlu1 %77  ;;  %v468_v26 = vmul.f32 %v1903_v22, %v389_v23 }
  0x8a   :  { %v502_v27 = vpop.permute.xlu0 %501 }
  0x8b   :  { %v579_v28 = vadd.f32 %v502_v27, %v467_v24  ;;  %v507_v29 = vpop.permute.xlu1 %506 }
  0x8c   :  { %v580_v30 = vadd.f32 %v507_v29, %v468_v26 }
  0x8d   :  { %v595_v31 = vmax.f32 %v579_v28, 0.0 }
  0x8e   :  { %v596_v32 = vmax.f32 %v580_v30, 0.0  ;;  %v394_v33 = vpop.permute.xlu0 %393 }
  0x8f   :  { %v399_v34 = vpop.permute.xlu1 %398  ;;  %v469_v37 = vmul.f32 %v1903_v22, %v394_v33 }
  0x90   :  { %v1438_v35 = vpack.c.bf16 %v596_v32, %v595_v31  ;;  %v470_v39 = vmul.f32 %v1903_v22, %v399_v34 }
  0x92   :  { %v1909_v36 = vpop.permute.xlu0 %82  ;;  %1439 = vmatprep.subr.bf16.mxu0 %v1438_v35 }
  0x93   :  { %v1912_v38 = vpop.permute.xlu1 %87  ;;  %1441 = vmatpush3.bf16.msra.mxu0 %v1438_v35 }
  0x96   :  { %v512_v40 = vpop.permute.xlu0 %511 }
  0x97   :  { %v581_v41 = vadd.f32 %v512_v40, %v469_v37  ;;  %v517_v42 = vpop.permute.xlu1 %516 }
  0x98   :  { %v582_v43 = vadd.f32 %v517_v42, %v470_v39 }
  0x99   :  { %v597_v44 = vmax.f32 %v581_v41, 0.0 }
  0x9a   :  { %v598_v45 = vmax.f32 %v582_v43, 0.0  ;;  %v404_v46 = vpop.permute.xlu0 %403 }
  0x9b   :  { %v409_v47 = vpop.permute.xlu1 %408  ;;  %v471_v51 = vmul.f32 %v1903_v22, %v404_v46 }
  0x9c   :  { %v1442_v48 = vpack.c.bf16 %v598_v45, %v597_v44  ;;  %v472_v52 = vmul.f32 %v1903_v22, %v409_v47 }
  0x9e   :  { %v1915_v49 = vpop.permute.xlu0 %92  ;;  %1443 = vmatprep.subr.bf16.mxu0 %v1442_v48 }
  0x9f   :  { %v1917_v50 = vpop.permute.xlu1 %97  ;;  %1445 = vmatpush3.bf16.msra.mxu0 %v1442_v48 }
  0xa2   :  { %v522_v53 = vpop.permute.xlu0 %521 }
  0xa3   :  { %v583_v54 = vadd.f32 %v522_v53, %v471_v51  ;;  %v527_v55 = vpop.permute.xlu1 %526 }
  0xa4   :  { %v584_v56 = vadd.f32 %v527_v55, %v472_v52 }
  0xa5   :  { %v599_v57 = vmax.f32 %v583_v54, 0.0 }
  0xa6   :  { %v600_v58 = vmax.f32 %v584_v56, 0.0  ;;  %v414_v59 = vpop.permute.xlu0 %413 }
  0xa7   :  { %v419_v60 = vpop.permute.xlu1 %418  ;;  %v473_v0 = vmul.f32 %v1903_v22, %v414_v59 }
  0xa8   :  { %v1446_v61 = vpack.c.bf16 %v600_v58, %v599_v57  ;;  %v474_v1 = vmul.f32 %v1903_v22, %v419_v60 }
  0xaa   :  { %1447 = vmatprep.subr.bf16.mxu0 %v1446_v61  ;;  %v1921_v62 = vpop.permute.xlu0 %102 }
  0xab   :  { %1449 = vmatpush3.bf16.msra.mxu0 %v1446_v61  ;;  %v1923_v63 = vpop.permute.xlu1 %107 }
  0xae   :  { %v532_v2 = vpop.permute.xlu0 %531 }
  0xaf   :  { %v585_v3 = vadd.f32 %v532_v2, %v473_v0  ;;  %v537_v4 = vpop.permute.xlu1 %536 }
  0xb0   :  { %v586_v5 = vadd.f32 %v537_v4, %v474_v1 }
  0xb1   :  { %v601_v6 = vmax.f32 %v585_v3, 0.0 }
  0xb2   :  { %v602_v7 = vmax.f32 %v586_v5, 0.0  ;;  %v424_v8 = vpop.permute.xlu0 %423 }
  0xb3   :  { %v429_v9 = vpop.permute.xlu1 %428  ;;  %v475_v13 = vmul.f32 %v1903_v22, %v424_v8 }
  0xb4   :  { %v1450_v10 = vpack.c.bf16 %v602_v7, %v601_v6  ;;  %v476_v14 = vmul.f32 %v1903_v22, %v429_v9 }
  0xb6   :  { %1451 = vmatprep.subr.bf16.mxu0 %v1450_v10  ;;  %v1927_v11 = vpop.permute.xlu0 %112 }
  0xb7   :  { %1453 = vmatpush3.bf16.msra.mxu0 %v1450_v10  ;;  %v1929_v12 = vpop.permute.xlu1 %117 }
  0xba   :  { %v542_v15 = vpop.permute.xlu0 %541 }
  0xbb   :  { %v587_v16 = vadd.f32 %v542_v15, %v475_v13  ;;  %v547_v17 = vpop.permute.xlu1 %546 }
  0xbc   :  { %v588_v18 = vadd.f32 %v547_v17, %v476_v14 }
  0xbd   :  { %v603_v19 = vmax.f32 %v587_v16, 0.0 }
  0xbe   :  { %v604_v20 = vmax.f32 %v588_v18, 0.0  ;;  %v434_v23 = vpop.permute.xlu0 %433 }
  0xbf   :  { %v439_v24 = vpop.permute.xlu1 %438  ;;  %v477_v29 = vmul.f32 %v1903_v22, %v434_v23 }
  0xc0   :  { %v1454_v26 = vpack.c.bf16 %v604_v20, %v603_v19  ;;  %v478_v30 = vmul.f32 %v1903_v22, %v439_v24 }
  0xc2   :  { %1455 = vmatprep.subr.bf16.mxu0 %v1454_v26  ;;  %v1933_v27 = vpop.permute.xlu0 %122 }
  0xc3   :  { %1457 = vmatpush3.bf16.msra.mxu0 %v1454_v26  ;;  %v1935_v28 = vpop.permute.xlu1 %127 }
  0xc6   :  { %v552_v31 = vpop.permute.xlu0 %551 }
  0xc7   :  { %v589_v32 = vadd.f32 %v552_v31, %v477_v29  ;;  %v557_v33 = vpop.permute.xlu1 %556 }
  0xc8   :  { %v590_v34 = vadd.f32 %v557_v33, %v478_v30 }
  0xc9   :  { %v605_v35 = vmax.f32 %v589_v32, 0.0 }
  0xca   :  { %v606_v37 = vmax.f32 %v590_v34, 0.0  ;;  %v444_v39 = vpop.permute.xlu0 %443 }
  0xcb   :  { %v449_v40 = vpop.permute.xlu1 %448  ;;  %v479_v44 = vmul.f32 %v1903_v22, %v444_v39 }
  0xcc   :  { %v1458_v41 = vpack.c.bf16 %v606_v37, %v605_v35  ;;  %v480_v45 = vmul.f32 %v1903_v22, %v449_v40  ;;  %v630_v40 = vld [vmem:[%s2107_s6 + $0x38] sm:$0xff] }
  0xce   :  { %1459 = vmatprep.subr.bf16.mxu0 %v1458_v41  ;;  %v1939_v42 = vpop.permute.xlu0 %132 }
  0xcf   :  { %1461 = vmatpush3.bf16.msra.mxu0 %v1458_v41  ;;  %v1941_v43 = vpop.permute.xlu1 %137 }
  0xd2   :  { %v562_v46 = vpop.permute.xlu0 %561 }
  0xd3   :  { %v591_v47 = vadd.f32 %v562_v46, %v479_v44  ;;  %v567_v48 = vpop.permute.xlu1 %566  ;;  %v631_v44 = vld [vmem:[%s2107_s6 + $0x48] sm:$0xff] }
  0xd4   :  { %v592_v51 = vadd.f32 %v567_v48, %v480_v45 }
  0xd5   :  { %v607_v52 = vmax.f32 %v591_v47, 0.0 }
  0xd6   :  { %v608_v53 = vmax.f32 %v592_v51, 0.0  ;;  %v454_v54 = vpop.permute.xlu0 %453  ;;  %v632_v51 = vld [vmem:[%s2107_s6 + $0x58] sm:$0xff] }
  0xd7   :  { %v459_v55 = vpop.permute.xlu1 %458  ;;  %v481_v2 = vmul.f32 %v1903_v22, %v454_v54 }
  0xd8   :  { %v1462_v56 = vpack.c.bf16 %v608_v53, %v607_v52  ;;  %v482_v5 = vmul.f32 %v1903_v22, %v459_v55  ;;  %v633_v53 = vld [vmem:[%s2107_s6 + $0x68] sm:$0xff] }
  0xd9   :  { %v1269_v57 = vpop.f32.mrb[0].mxu1 }
  0xda   :  { %v275_v58 = vadd.f32 %v1269_v57, %v1906_v25  ;;  %v269_v59 = vpop.f32.mrb[1].mxu1  ;;  %1463 = vmatprep.subr.bf16.mxu0 %v1462_v56  ;;  %v1946_v60 = vpop.permute.xlu0 %142 }
  0xdb   :  { %v270_v61 = vadd.f32 %v269_v59, %v1898_v21  ;;  %1465 = vmatpush3.bf16.msra.mxu0 %v1462_v56  ;;  %v1949_v0 = vpop.permute.xlu1 %147 }
  0xdc   :  { %v349_v1 = vmax.f32 %v275_v58, 0.0  ;;  %v634_v58 = vld [vmem:[%s2107_s6 + $0x78] sm:$0xff] }
  0xdd   :  { %v348_v3 = vmax.f32 %v270_v61, 0.0  ;;  %v1272_v4 = vpop.f32.mrb[2].mxu1  ;;  %v635_v61 = vld [vmem:[%s2107_s6 + $0x88] sm:$0xff] }
  0xde   :  { %v285_v6 = vadd.f32 %v1272_v4, %v1912_v38  ;;  %v279_v7 = vpop.f32.mrb[3].mxu1  ;;  %v572_v25 = vpop.permute.xlu0 %571 }
  0xdf   :  { %v1470_v8 = vpack.c.bf16 %v349_v1, %v348_v3  ;;  %v280_v9 = vadd.f32 %v279_v7, %v1909_v36  ;;  %v593_v10 = vadd.f32 %v572_v25, %v481_v2  ;;  %v577_v13 = vpop.permute.xlu1 %576  ;;  %v637_v7 = vld [vmem:[%s2107_s6 + $0xa8] sm:$0xff] }
  0xe0   :  { %v351_v21 = vmax.f32 %v285_v6, 0.0  ;;  %v594_v14 = vadd.f32 %v577_v13, %v482_v5  ;;  %v636_v5 = vld [vmem:[%s2107_s6 + $0x98] sm:$0xff] }
  0xe1   :  { %v350_v15 = vmax.f32 %v280_v9, 0.0  ;;  %v609_v16 = vmax.f32 %v593_v10, 0.0  ;;  %v1275_v17 = vpop.f32.mrb[4].mxu1  ;;  %1471 = vmatprep.subr.bf16.mxu1 %v1470_v8  ;;  %v612_v9 = vld [vmem:[%s2107_s6 + $0x10] sm:$0xff]  ;;  %v613_v10 = vld [vmem:[%s2107_s6 + $0x20] sm:$0xff]  ;;  %v640_v13 = vld [vmem:[%s2107_s6 + $0xd8] sm:$0xff] }
  0xe2   :  { %v610_v18 = vmax.f32 %v594_v14, 0.0  ;;  %v295_v19 = vadd.f32 %v1275_v17, %v1917_v50  ;;  %v289_v20 = vpop.f32.mrb[5].mxu1  ;;  %1473 = vmatpush3.bf16.msra.mxu1 %v1470_v8  ;;  %v628_v50 = vld [vmem:[%s2107_s6 + $0x18] sm:$0xff]  ;;  %v639_v8 = vld [vmem:[%s2107_s6 + $0xc8] sm:$0xff]  ;;  %v614_v14 = vld [vmem:[%s2107_s6 + $0x30] sm:$0xff] }
  0xe3   :  { %v1474_v22 = vpack.c.bf16 %v351_v21, %v350_v15  ;;  %v290_v38 = vadd.f32 %v289_v20, %v1915_v49  ;;  %v629_v49 = vld [vmem:[%s2107_s6 + $0x28] sm:$0xff]  ;;  %v615_v15 = vld [vmem:[%s2107_s6 + $0x40] sm:$0xff]  ;;  %v616_v17 = vld [vmem:[%s2107_s6 + $0x50] sm:$0xff] }
  0xe4   :  { %v1466_v23 = vpack.c.bf16 %v610_v18, %v609_v16  ;;  %v353_v24 = vmax.f32 %v295_v19, 0.0  ;;  %v641_v21 = vld [vmem:[%s2107_s6 + $0xe8] sm:$0xff]  ;;  %v642_v16 = vld [vmem:[%s2107_s6 + $0xf8] sm:$0xff]  ;;  %v617_v18 = vld [vmem:[%s2107_s6 + $0x60] sm:$0xff] }
  0xe5   :  { %v352_v26 = vmax.f32 %v290_v38, 0.0  ;;  %v1278_v36 = vpop.f32.mrb[6].mxu1  ;;  %1475 = vmatprep.subr.bf16.mxu1 %v1474_v22  ;;  %v618_v19 = vld [vmem:[%s2107_s6 + $0x70] sm:$0xff]  ;;  %v619_v20 = vld [vmem:[%s2107_s6 + $0x80] sm:$0xff] }
  0xe6   :  { %v305_v29 = vadd.f32 %v1278_v36, %v1923_v63  ;;  %v299_v30 = vpop.f32.mrb[7].mxu1  ;;  %1477 = vmatpush3.bf16.msra.mxu1 %v1474_v22  ;;  %1467 = vmatprep.subr.bf16.mxu0 %v1466_v23  ;;  %v620_v22 = vld [vmem:[%s2107_s6 + $0x90] sm:$0xff]  ;;  %v621_v38 = vld [vmem:[%s2107_s6 + $0xa0] sm:$0xff] }
  0xe7   :  { %v1478_v31 = vpack.c.bf16 %v353_v24, %v352_v26  ;;  %v300_v32 = vadd.f32 %v299_v30, %v1921_v62  ;;  %1469 = vmatpush3.bf16.msra.mxu0 %v1466_v23  ;;  %v622_v23 = vld [vmem:[%s2107_s6 + $0xb0] sm:$0xff]  ;;  %v623_v24 = vld [vmem:[%s2107_s6 + $0xc0] sm:$0xff]  ;;  %v1574_v30 = vmov 0.0|0.0  }
  0xe8   :  { %v355_v33 = vmax.f32 %v305_v29, 0.0  ;;  %v624_v26 = vld [vmem:[%s2107_s6 + $0xd0] sm:$0xff]  ;;  %v625_v36 = vld [vmem:[%s2107_s6 + $0xe0] sm:$0xff]  ;;  %1502 = vmatprep.subr.bf16.mxu0 %v1574_v30 }
  0xe9   :  { %v354_v34 = vmax.f32 %v300_v32, 0.0  ;;  %v1281_v35 = vpop.f32.mrb[8].mxu1  ;;  %1479 = vmatprep.subr.bf16.mxu1 %v1478_v31  ;;  %v626_v29 = vld [vmem:[%s2107_s6 + $0xf0] sm:$0xff] }
  0xea   :  { %v315_v63 = vadd.f32 %v1281_v35, %v1929_v12  ;;  %v309_v37 = vpop.f32.mrb[9].mxu1  ;;  %1481 = vmatpush3.bf16.msra.mxu1 %v1478_v31  ;;  %1324 = vmatmul.mubr.f32.vlgmr.msra.gmra.mrb[0].mxu0 %v628_v50  ;;  %v1576_v31 = vmov 0.0  }
  0xeb   :  { %v1482_v39 = vpack.c.bf16 %v355_v33, %v354_v34  ;;  %v310_v62 = vadd.f32 %v309_v37, %v1927_v11  ;;  %1326 = vmatprep.mubr.f32.mxu0 %v629_v49  ;;  %v957_v37 = vpop.permute.xlu1 %956 }
  0xec   :  { %v357_v41 = vmax.f32 %v315_v63, 0.0  ;;  %v952_v63 = vpop.permute.xlu0 %951 }
  0xed   :  { %v356_v45 = vmax.f32 %v310_v62, 0.0  ;;  %v1284_v46 = vpop.f32.mrb[10].mxu1  ;;  %1483 = vmatprep.subr.bf16.mxu1 %v1482_v39 }
  0xee   :  { %v325_v12 = vadd.f32 %v1284_v46, %v1935_v28  ;;  %v319_v47 = vpop.f32.mrb[11].mxu1  ;;  %1485 = vmatpush3.bf16.msra.mxu1 %v1482_v39  ;;  %1327 = vmatmul.mubr.f32.gmra.mrb[2].mxu0 %v630_v40 }
  0xef   :  { %v1486_v48 = vpack.c.bf16 %v357_v41, %v356_v45  ;;  %v320_v11 = vadd.f32 %v319_v47, %v1933_v27  ;;  %1329 = vmatprep.mubr.f32.mxu0 %v631_v44  ;;  %v967_v44 = vpop.permute.xlu1 %966 }
  0xf0   :  { %v359_v52 = vmax.f32 %v325_v12, 0.0  ;;  %v962_v40 = vpop.permute.xlu0 %961 }
  0xf1   :  { %v358_v54 = vmax.f32 %v320_v11, 0.0  ;;  %v1287_v55 = vpop.f32.mrb[12].mxu1  ;;  %1487 = vmatprep.subr.bf16.mxu1 %v1486_v48 }
  0xf2   :  { %v335_v28 = vadd.f32 %v1287_v55, %v1941_v43  ;;  %v329_v56 = vpop.f32.mrb[13].mxu1  ;;  %1489 = vmatpush3.bf16.msra.mxu1 %v1486_v48  ;;  %1330 = vmatmul.mubr.f32.gmra.mrb[4].mxu0 %v632_v51 }
  0xf3   :  { %v1490_v57 = vpack.c.bf16 %v359_v52, %v358_v54  ;;  %v330_v27 = vadd.f32 %v329_v56, %v1939_v42  ;;  %1332 = vmatprep.mubr.f32.mxu0 %v633_v53  ;;  %v977_v48 = vpop.permute.xlu1 %976 }
  0xf4   :  { %v361_v59 = vmax.f32 %v335_v28, 0.0  ;;  %v972_v47 = vpop.permute.xlu0 %971 }
  0xf5   :  { %v360_v1 = vmax.f32 %v330_v27, 0.0  ;;  %v1290_v2 = vpop.f32.mrb[14].mxu1  ;;  %1491 = vmatprep.subr.bf16.mxu1 %v1490_v57 }
  0xf6   :  { %v345_v43 = vadd.f32 %v1290_v2, %v1949_v0  ;;  %v339_v3 = vpop.f32.mrb[15].mxu1  ;;  %1493 = vmatpush3.bf16.msra.mxu1 %v1490_v57  ;;  %1333 = vmatmul.mubr.f32.gmra.mrb[6].mxu0 %v634_v58 }
  0xf7   :  { %v1494_v4 = vpack.c.bf16 %v361_v59, %v360_v1  ;;  %v340_v42 = vadd.f32 %v339_v3, %v1946_v60  ;;  %1335 = vmatprep.mubr.f32.mxu0 %v635_v61  ;;  %v638_v60 = vld [vmem:[%s2107_s6 + $0xb8] sm:$0xff]  ;;  %v987_v1 = vpop.permute.xlu1 %986 }
  0xf8   :  { %v363_v6 = vmax.f32 %v345_v43, 0.0 }
  0xf9   :  { %v362_v25 = vmax.f32 %v340_v42, 0.0  ;;  %1495 = vmatprep.subr.bf16.mxu1 %v1494_v4 }
  0xfa   :  { %1497 = vmatpush3.bf16.msra.mxu1 %v1494_v4  ;;  %1336 = vmatmul.mubr.f32.gmra.mrb[8].mxu0 %v636_v5  ;;  %v982_v4 = vpop.permute.xlu0 %981 }
  0xfb   :  { %v1498_v0 = vpack.c.bf16 %v363_v6, %v362_v25  ;;  %1338 = vmatprep.mubr.f32.mxu0 %v637_v7 }
  0xfd   :  { %1499 = vmatprep.subr.bf16.mxu1 %v1498_v0 }
  0xfe   :  { %1501 = vmatpush3.bf16.msra.mxu1 %v1498_v0  ;;  %1339 = vmatmul.mubr.f32.gmra.mrb[10].mxu0 %v638_v60 }
  0xff   :  { %1341 = vmatprep.mubr.f32.mxu0 %v639_v8 }
 0x101   :  { %1380 = vmatmul.mubr.f32.vlgmr.msra.gmra.mrb[16].mxu1 %v612_v9 }
 0x102   :  { %1382 = vmatprep.mubr.f32.mxu1 %v613_v10  ;;  %1342 = vmatmul.mubr.f32.gmra.mrb[12].mxu0 %v640_v13  ;;  %v997_v13 = vpop.permute.xlu1 %996 }
 0x103   :  { %1344 = vmatprep.mubr.f32.mxu0 %v641_v21 }
 0x105   :  { %1383 = vmatmul.mubr.f32.gmra.mrb[18].mxu1 %v614_v14 }
 0x106   :  { %1385 = vmatprep.mubr.f32.mxu1 %v615_v15  ;;  %1345 = vmatmul.mubr.f32.gmra.mrb[14].mxu0 %v642_v16  ;;  %v992_v16 = vpop.permute.xlu0 %991 }
 0x107   :  { %1435 = vmatprep.mubr.msk.f32.mxu0 %vm1575_vm2, %v1576_v31 }
 0x109   :  { %1386 = vmatmul.mubr.f32.gmra.mrb[20].mxu1 %v616_v17 }
 0x10a   :  { %1388 = vmatprep.mubr.f32.mxu1 %v617_v18 }
 0x10d   :  { %1389 = vmatmul.mubr.f32.gmra.mrb[22].mxu1 %v618_v19 }
 0x10e   :  { %1391 = vmatprep.mubr.f32.mxu1 %v619_v20 }
 0x111   :  { %1392 = vmatmul.mubr.f32.gmra.mrb[24].mxu1 %v620_v22 }
 0x112   :  { %1394 = vmatprep.mubr.f32.mxu1 %v621_v38 }
 0x115   :  { %1395 = vmatmul.mubr.f32.gmra.mrb[26].mxu1 %v622_v23 }
 0x116   :  { %1397 = vmatprep.mubr.f32.mxu1 %v623_v24 }
 0x119   :  { %1398 = vmatmul.mubr.f32.gmra.mrb[28].mxu1 %v624_v26 }
 0x11a   :  { %1400 = vmatprep.mubr.f32.mxu1 %v625_v36 }
 0x11d   :  { %1401 = vmatmul.mubr.f32.gmra.mrb[30].mxu1 %v626_v29 }
 0x1bd   :  { %v1325_v32 = vpop.f32.mrb[0].mxu0 }
 0x1be   :  { %v709_v50 = vpop.f32.mrb[1].mxu0 }
 0x1c1   :  { %v1328_v33 = vpop.f32.mrb[2].mxu0 }
 0x1c2   :  { %v719_v49 = vpop.f32.mrb[3].mxu0 }
 0x1c5   :  { %v1331_v34 = vpop.f32.mrb[4].mxu0 }
 0x1c6   :  { %v729_v35 = vpop.f32.mrb[5].mxu0 }
 0x1c9   :  { %v1334_v39 = vpop.f32.mrb[6].mxu0 }
 0x1ca   :  { %v739_v62 = vpop.f32.mrb[7].mxu0 }
 0x1cd   :  { %v1337_v41 = vpop.f32.mrb[8].mxu0 }
 0x1ce   :  { %v749_v45 = vpop.f32.mrb[9].mxu0 }
 0x1d1   :  { %v2058_v46 = vpop.f32.mrb[10].mxu0 }
 0x1d2   :  { %v2060_v12 = vpop.f32.mrb[11].mxu0 }
 0x1d4   :  { %v1381_v11 = vpop.f32.mrb[16].mxu1 }
 0x1d5   :  { %v860_v51 = vadd.f32 %v1381_v11, %v1325_v32  ;;  %v854_v52 = vpop.f32.mrb[17].mxu1  ;;  %v2062_v53 = vpop.f32.mrb[12].mxu0 }
 0x1d6   :  { %v855_v54 = vadd.f32 %v854_v52, %v709_v50  ;;  %v2064_v55 = vpop.f32.mrb[13].mxu0  ;;  %v1007_v32 = vpop.permute.xlu1 %1006 }
 0x1d7   :  { %v1030_v28 = vadd.f32 %v957_v37, %v860_v51 }
 0x1d8   :  { %v1029_v56 = vadd.f32 %v952_v63, %v855_v54  ;;  %v1384_v57 = vpop.f32.mrb[18].mxu1 }
 0x1d9   :  { %v1046_v27 = vmax.f32 %v1030_v28, 0.0  ;;  %v870_v58 = vadd.f32 %v1384_v57, %v1328_v33  ;;  %v864_v59 = vpop.f32.mrb[19].mxu1  ;;  %v2066_v61 = vpop.f32.mrb[14].mxu0 }
 0x1da   :  { %v1045_v2 = vmax.f32 %v1029_v56, 0.0  ;;  %v865_v43 = vadd.f32 %v864_v59, %v719_v49  ;;  %v2068_v3 = vpop.f32.mrb[15].mxu0  ;;  %v1002_v49 = vpop.permute.xlu0 %1001 }
 0x1db   :  { %v1032_v42 = vadd.f32 %v967_v44, %v870_v58 }
 0x1dc   :  { %v1503_v5 = vpack.c.bf16 %v1046_v27, %v1045_v2  ;;  %v1031_v6 = vadd.f32 %v962_v40, %v865_v43  ;;  %v1387_v7 = vpop.f32.mrb[20].mxu1 }
 0x1dd   :  { %v1048_v25 = vmax.f32 %v1032_v42, 0.0  ;;  %v880_v0 = vadd.f32 %v1387_v7, %v1331_v34  ;;  %v874_v60 = vpop.f32.mrb[21].mxu1 }
 0x1de   :  { %v1047_v8 = vmax.f32 %v1031_v6, 0.0  ;;  %v875_v9 = vadd.f32 %v874_v60, %v729_v35  ;;  %1504 = vmatpush3.bf16.msra.mxu0 %v1503_v5  ;;  %v1012_v52 = vpop.permute.xlu0 %1011 }
 0x1df   :  { %v1034_v10 = vadd.f32 %v977_v48, %v880_v0  ;;  %1505 = vmatprep.subr.bf16.mxu0 %v1574_v30 }
 0x1e0   :  { %v1506_v21 = vpack.c.bf16 %v1048_v25, %v1047_v8  ;;  %v1033_v14 = vadd.f32 %v972_v47, %v875_v9  ;;  %v1390_v15 = vpop.f32.mrb[22].mxu1 }
 0x1e1   :  { %v1050_v17 = vmax.f32 %v1034_v10, 0.0  ;;  %v890_v18 = vadd.f32 %v1390_v15, %v1334_v39  ;;  %v884_v19 = vpop.f32.mrb[23].mxu1 }
 0x1e2   :  { %v1049_v20 = vmax.f32 %v1033_v14, 0.0  ;;  %v885_v22 = vadd.f32 %v884_v19, %v739_v62  ;;  %1507 = vmatpush3.bf16.msra.mxu0 %v1506_v21 }
 0x1e3   :  { %v1036_v38 = vadd.f32 %v987_v1, %v890_v18  ;;  %1508 = vmatprep.subr.bf16.mxu0 %v1574_v30 }
 0x1e4   :  { %v1509_v23 = vpack.c.bf16 %v1050_v17, %v1049_v20  ;;  %v1035_v24 = vadd.f32 %v982_v4, %v885_v22  ;;  %v1393_v26 = vpop.f32.mrb[24].mxu1 }
 0x1e5   :  { %v1052_v36 = vmax.f32 %v1036_v38, 0.0  ;;  %v900_v29 = vadd.f32 %v1393_v26, %v1337_v41  ;;  %v894_v31 = vpop.f32.mrb[25].mxu1 }
 0x1e6   :  { %v1051_v50 = vmax.f32 %v1035_v24, 0.0  ;;  %v895_v33 = vadd.f32 %v894_v31, %v749_v45  ;;  %1510 = vmatpush3.bf16.msra.mxu0 %v1509_v23  ;;  %v1017_v45 = vpop.permute.xlu1 %1016 }
 0x1e7   :  { %v1038_v34 = vadd.f32 %v997_v13, %v900_v29  ;;  %1511 = vmatprep.subr.bf16.mxu0 %v1574_v30 }
 0x1e8   :  { %v1512_v35 = vpack.c.bf16 %v1052_v36, %v1051_v50  ;;  %v1037_v63 = vadd.f32 %v992_v16, %v895_v33  ;;  %v1396_v37 = vpop.f32.mrb[26].mxu1 }
 0x1e9   :  { %v1054_v39 = vmax.f32 %v1038_v34, 0.0  ;;  %v910_v62 = vadd.f32 %v1396_v37, %v2058_v46  ;;  %v904_v40 = vpop.f32.mrb[27].mxu1 }
 0x1ea   :  { %v1053_v44 = vmax.f32 %v1037_v63, 0.0  ;;  %v905_v47 = vadd.f32 %v904_v40, %v2060_v12  ;;  %1513 = vmatpush3.bf16.msra.mxu0 %v1512_v35  ;;  %v1027_v4 = vpop.permute.xlu1 %1026 }
 0x1eb   :  { %v1040_v41 = vadd.f32 %v1007_v32, %v910_v62  ;;  %1514 = vmatprep.subr.bf16.mxu0 %v1574_v30 }
 0x1ec   :  { %v1515_v48 = vpack.c.bf16 %v1054_v39, %v1053_v44  ;;  %v1039_v11 = vadd.f32 %v1002_v49, %v905_v47  ;;  %v1399_v51 = vpop.f32.mrb[28].mxu1 }
 0x1ed   :  { %v1056_v54 = vmax.f32 %v1040_v41, 0.0  ;;  %v920_v28 = vadd.f32 %v1399_v51, %v2062_v53  ;;  %v914_v56 = vpop.f32.mrb[29].mxu1  ;;  %v1022_v53 = vpop.permute.xlu0 %1021 }
 0x1ee   :  { %v1055_v57 = vmax.f32 %v1039_v11, 0.0  ;;  %v915_v46 = vadd.f32 %v914_v56, %v2064_v55  ;;  %1516 = vmatpush3.bf16.msra.mxu0 %v1515_v48 }
 0x1ef   :  { %v1042_v27 = vadd.f32 %v1017_v45, %v920_v28  ;;  %1517 = vmatprep.subr.bf16.mxu0 %v1574_v30 }
 0x1f0   :  { %v1518_v12 = vpack.c.bf16 %v1056_v54, %v1055_v57  ;;  %v1041_v58 = vadd.f32 %v1012_v52, %v915_v46  ;;  %v1402_v59 = vpop.f32.mrb[30].mxu1 }
 0x1f1   :  { %v1058_v1 = vmax.f32 %v1042_v27, 0.0  ;;  %v930_v2 = vadd.f32 %v1402_v59, %v2066_v61  ;;  %v924_v43 = vpop.f32.mrb[31].mxu1  ;;  %v1061_v61 = vld [vmem:[%s2109_s8] sm:$0x1] }
 0x1f2   :  { %v1057_v42 = vmax.f32 %v1041_v58, 0.0  ;;  %v925_v5 = vadd.f32 %v924_v43, %v2068_v3  ;;  %1519 = vmatpush3.bf16.msra.mxu0 %v1518_v12  ;;  %v1063_v3 = vstv %s2110_s9 }
 0x1f3   :  { %v1044_v6 = vadd.f32 %v1027_v4, %v930_v2  ;;  %1520 = vmatprep.subr.bf16.mxu0 %v1574_v30 }
 0x1f4   :  { %v1521_v55 = vpack.c.bf16 %v1058_v1, %v1057_v42  ;;  %v1043_v7 = vadd.f32 %v1022_v53, %v925_v5 }
 0x1f5   :  { %v1060_v25 = vmax.f32 %v1044_v6, 0.0 }
 0x1f6   :  { %v1059_v0 = vmax.f32 %v1043_v7, 0.0  ;;  %1522 = vmatpush3.bf16.msra.mxu0 %v1521_v55 }
 0x1f7   :  { %1523 = vmatprep.subr.bf16.mxu0 %v1574_v30 }
 0x1f8   :  { %v1524_v60 = vpack.c.bf16 %v1060_v25, %v1059_v0 }
 0x1fa   :  { %1525 = vmatpush3.bf16.msra.mxu0 %v1524_v60 }
 0x1fd   :  { %1436 = vmatmul.mubr.f32.vlgmr.msra.gmra.mrb[16].mxu0 %v1061_v61 }
 0x2d0   :  { %v1130_v8 = vpop.f32.mrb[16].mxu0 }
 0x2d1   :  { %v1131_v9 = vadd.f32 %v1130_v8, %v1063_v3  ;;  %v1437_v10 = vpop.f32.mrb[17].mxu0 }
 0x2d3   :  { %1134 = vst [vmem:[#allocation3] sm:$0x1] %v1131_v9 }
 0x2d4   :  { %1560 = shalt.err (!%p1557_p4)
}
 0x2d5   :  { %s1561_s4 = scalar_lea.hbm %s2111_s10, 16 }
 0x2d6   :  { %p1562_p5 = scmp.ne.s32.totalorder %s2111_s10, %s1561_s4  ;;  %p1565_p6 = scmp.lt.u32.totalorder %s1561_s4, %s2111_s10 }
 0x2d8   :  { %p1567_p7 = pnand %p1565_p6, %p1562_p5 }
 0x2da   :  { %1570 = shalt.err (!%p1567_p7)
}
 0x2db   :  { %1144 = dma.vmem_to_hbm [thread:$0]  %s1142_s30, 16, %s2111_s10, [#allocation4]  }
 0x2dc   :  { %1571 = dma.done.wait [#allocation4], 16  }
 0x2dd   :  { %1572 = vsyncadd [#allocation4], 4294967280 }
 0x2de   :  { %1148 = vsyncpa [#allocation4], 1 }

</bundles_post_ra>
